<compile_context>
chip_gen: v6e
topology: v6e:2x2x1
jax: 0.10.0
libtpu: 0.0.40
codegen_flags: <defaults>
</compile_context>

<pallas_src>
import functools

import jax
import jax.numpy as jnp
from jax.experimental import pallas as pl
from jax.experimental.pallas import tpu as pltpu

_VMEM_LIMIT = 32 << 20  # uniform scoped-VMEM budget, safe on v5e/v6e/v7x


def _largest_divisor(n, base, cap):
    """Largest divisor of n that is a multiple of `base` and <= cap; else n (full dim)."""
    d = (min(cap, n) // base) * base
    while d >= base:
        if n % d == 0:
            return d
        d -= base
    return n


def _pick_bt(B, slab_bytes, target_bytes=4 << 20):
    """Batches per grid step: divides B, per-step block ~target_bytes, and keeps
    grid extent >= 2 when B >= 2 so both v7x TensorCores are used."""
    if B <= 1:
        return 1
    cap = max(1, B // 2)
    bt = 1
    for d in range(2, cap + 1):
        if B % d == 0 and d * slab_bytes <= target_bytes:
            bt = d
    return bt


# ---------------------------------------------------------------------------
# Fused kernel: pool + MLP + gate on one resident (bt, C, HW) slab.
# ---------------------------------------------------------------------------
def _fused_kernel(inv_hw, x_ref, w1t_ref, b1_ref, w2t_ref, b2_ref, o_ref):
    x = x_ref[...]                                              # (bt, C, HW), native dtype
    pooled = jnp.sum(x.astype(jnp.float32), axis=-1) * inv_hw   # (bt, C) mean, f32
    h = jnp.dot(pooled, w1t_ref[...], preferred_element_type=jnp.float32) + b1_ref[...]
    h = jnp.maximum(h, 0.0)
    s = jnp.dot(h, w2t_ref[...], preferred_element_type=jnp.float32) + b2_ref[...]
    s = jax.nn.sigmoid(s)                                       # (bt, C)
    o_ref[...] = x * s[:, :, None].astype(o_ref.dtype)


# ---------------------------------------------------------------------------
# Fallback pass 1: spatial sums per (b, c) row on a flattened (B*C, HW) view.
# ---------------------------------------------------------------------------
def _pool_sum_kernel(x_ref, sum_ref):
    @pl.when(pl.program_id(1) == 0)
    def _():
        sum_ref[...] = jnp.zeros_like(sum_ref)

    sum_ref[...] += jnp.sum(x_ref[...].astype(jnp.float32), axis=-1, keepdims=True)


# ---------------------------------------------------------------------------
# Fallback pass 2: out = s * x in the input's native dtype.
# ---------------------------------------------------------------------------
def _gate_kernel(x_ref, s_ref, o_ref):
    o_ref[...] = x_ref[...] * s_ref[...].astype(o_ref.dtype)


def channel_attention(x, w1, b1, w2, b2, *, donate_input=False, force_multipass=False):
    """x: (B, C, H, W) NCHW; w1: (C//2, C); b1: (C//2,); w2: (C, C//2); b2: (C,)."""
    B, C, H, W = x.shape
    C2 = w1.shape[0]
    HW = H * W
    itemsize = jnp.dtype(x.dtype).itemsize

    # Tiny-weight prep (once per call; negligible vs the streaming traffic).
    w1t = jnp.asarray(w1, jnp.float32).T            # (C, C2)
    b1r = jnp.asarray(b1, jnp.float32).reshape(1, C2)
    w2t = jnp.asarray(w2, jnp.float32).T            # (C2, C)
    b2r = jnp.asarray(b2, jnp.float32).reshape(1, C)

    slab = C * HW * itemsize                        # one batch's (C, HW) slab
    weight_bytes = 4 * (2 * C * C2 + C2 + C)
    fused_ok = (not force_multipass) and (4 * slab + 2 * weight_bytes <= (3 * _VMEM_LIMIT) // 4)

    io_alias = {0: 0} if donate_input else {}

    if fused_ok:
        # ------------------ fused single-pass path (2x HBM traffic) ------------------
        xv = x.reshape(B, C, HW)                    # contiguous merge, no copy
        bt = _pick_bt(B, slab)

        out = pl.pallas_call(
            functools.partial(_fused_kernel, 1.0 / float(HW)),
            out_shape=jax.ShapeDtypeStruct((B, C, HW), x.dtype),
            grid_spec=pltpu.PrefetchScalarGridSpec(
                num_scalar_prefetch=0,
                grid=(B // bt,),
                in_specs=[
                    pl.BlockSpec((bt, C, HW), lambda i: (i, 0, 0)),   # x slab
                    pl.BlockSpec((C, C2), lambda i: (0, 0)),          # w1^T
                    pl.BlockSpec((1, C2), lambda i: (0, 0)),          # b1
                    pl.BlockSpec((C2, C), lambda i: (0, 0)),          # w2^T
                    pl.BlockSpec((1, C), lambda i: (0, 0)),           # b2
                ],
                out_specs=pl.BlockSpec((bt, C, HW), lambda i: (i, 0, 0)),
            ),
            compiler_params=pltpu.CompilerParams(
                dimension_semantics=("parallel",),
                vmem_limit_bytes=_VMEM_LIMIT),
            cost_estimate=pl.CostEstimate(
                flops=2 * B * C * HW + 4 * B * C * C2,
                transcendentals=B * C,
                bytes_accessed=2 * B * C * HW * itemsize),
            input_output_aliases=io_alias,
        )(xv, w1t, b1r, w2t, b2r)
        return out.reshape(B, C, H, W)

    # ------------------ fallback: 2 streaming passes + jnp MLP ------------------
    # Used only when one batch's (C, HW) slab is too big for VMEM residency.
    BC = B * C
    xf = x.reshape(BC, HW)                          # contiguous merge, no copy
    sub = 8 * max(1, 4 // itemsize)                 # sublane packing for dtype (bf16→16, int8→32)
    hwt = _largest_divisor(HW, 128, 4096)           # lane tile (or full HW if not 128-divisible)
    max_rt = max(sub, (4 << 20) // max(1, hwt * itemsize))
    rt = _largest_divisor(BC, sub, max_rt)          # row tile (or full BC)
    n_rows = BC // rt
    n_hw = HW // hwt

    sums = pl.pallas_call(
        _pool_sum_kernel,
        out_shape=jax.ShapeDtypeStruct((BC, 1), jnp.float32),
        grid_spec=pltpu.PrefetchScalarGridSpec(
            num_scalar_prefetch=0,
            grid=(n_rows, n_hw),
            in_specs=[pl.BlockSpec((rt, hwt), lambda i, j: (i, j))],
            out_specs=pl.BlockSpec((rt, 1), lambda i, j: (i, 0)),
        ),
        compiler_params=pltpu.CompilerParams(
            dimension_semantics=("parallel", "arbitrary"),
            vmem_limit_bytes=_VMEM_LIMIT),
        cost_estimate=pl.CostEstimate(
            flops=BC * HW, transcendentals=0,
            bytes_accessed=BC * HW * itemsize + BC * 4),
    )(xf)

    # Tiny MLP (O(B*C^2) flops, microseconds) in plain jnp between the passes.
    pooled = sums.reshape(B, C) * (1.0 / float(HW))
    h = jnp.maximum(pooled @ w1t + b1r, 0.0)
    s = jax.nn.sigmoid(h @ w2t + b2r).reshape(BC, 1)

    out = pl.pallas_call(
        _gate_kernel,
        out_shape=jax.ShapeDtypeStruct((BC, HW), x.dtype),
        grid_spec=pltpu.PrefetchScalarGridSpec(
            num_scalar_prefetch=0,
            grid=(n_rows, n_hw),
            in_specs=[
                pl.BlockSpec((rt, hwt), lambda i, j: (i, j)),
                pl.BlockSpec((rt, 1), lambda i, j: (i, 0)),
            ],
            out_specs=pl.BlockSpec((rt, hwt), lambda i, j: (i, j)),
        ),
        compiler_params=pltpu.CompilerParams(
            dimension_semantics=("parallel", "parallel"),
            vmem_limit_bytes=_VMEM_LIMIT),
        cost_estimate=pl.CostEstimate(
            flops=BC * HW, transcendentals=0,
            bytes_accessed=2 * BC * HW * itemsize + BC * 4),
        input_output_aliases=io_alias,
    )(xf, s)
    return out.reshape(B, C, H, W)


def channel_attention_ref(x, w1, b1, w2, b2):
    pooled = jnp.mean(x, axis=(2, 3))                       # (B, C)
    h = jnp.maximum(pooled @ w1.T + b1, 0.0)                # (B, C//2)
    s = jax.nn.sigmoid(h @ w2.T + b2)                       # (B, C)
    return s[:, :, None, None] * x


if __name__ == "__main__":
    B, C, H, W = 2, 4, 16, 16
    key = jax.random.PRNGKey(0)
    kx, kw1, kb1, kw2, kb2 = jax.random.split(key, 5)

    x = jax.random.normal(kx, (B, C, H, W), dtype=jnp.float32)
    # nn.Linear(C, C//2) -> weight (C//2, C), bias (C//2,)
    w1 = jax.random.normal(kw1, (C // 2, C), dtype=jnp.float32) * 0.1
    b1 = jax.random.normal(kb1, (C // 2,), dtype=jnp.float32) * 0.1
    # nn.Linear(C//2, C) -> weight (C, C//2), bias (C,)
    w2 = jax.random.normal(kw2, (C, C // 2), dtype=jnp.float32) * 0.1
    b2 = jax.random.normal(kb2, (C,), dtype=jnp.float32) * 0.1

    ref = channel_attention_ref(x, w1, b1, w2, b2)

    # Fused single-pass path (primary).
    out = jax.block_until_ready(channel_attention(x, w1, b1, w2, b2))
    assert out.shape == (B, C, H, W)
    assert jnp.allclose(out, ref, atol=1e-5, rtol=1e-5), "fused path mismatch vs reference"

    # Streaming fallback path (exercised here for correctness coverage).
    out_mp = jax.block_until_ready(
        channel_attention(x, w1, b1, w2, b2, force_multipass=True))
    assert jnp.allclose(out_mp, ref, atol=1e-5, rtol=1e-5), "multipass path mismatch vs reference"

    print("KERNEL_OK")
</pallas_src>

<mosaic_0001>
module attributes {stable_mosaic.version = 11 : i64} {
  func.func @_fused_kernel(%arg0: i32, %arg1: memref<1x4x256xf32, #tpu.memory_space<vmem>>, %arg2: memref<4x2xf32, #tpu.memory_space<vmem>>, %arg3: memref<1x2xf32, #tpu.memory_space<vmem>>, %arg4: memref<2x4xf32, #tpu.memory_space<vmem>>, %arg5: memref<1x4xf32, #tpu.memory_space<vmem>>, %arg6: memref<1x4x256xf32, #tpu.memory_space<vmem>>) attributes {dimension_semantics = [#tpu.dimension_semantics<parallel>], iteration_bounds = array<i64: 2>, scalar_prefetch = 0 : i64, scratch_operands = 0 : i64, tpu.core_type = #tpu.core_type<tc>, window_params = [{transform_indices = @transform_0, window_bounds = array<i64: 1, 4, 256>}, {pipeline_mode = #tpu.pipeline_mode<synchronous>, transform_indices = @transform_1, window_bounds = array<i64: 4, 2>}, {pipeline_mode = #tpu.pipeline_mode<synchronous>, transform_indices = @transform_2, window_bounds = array<i64: 1, 2>}, {pipeline_mode = #tpu.pipeline_mode<synchronous>, transform_indices = @transform_3, window_bounds = array<i64: 2, 4>}, {pipeline_mode = #tpu.pipeline_mode<synchronous>, transform_indices = @transform_4, window_bounds = array<i64: 1, 4>}, {transform_indices = @transform_5, window_bounds = array<i64: 1, 4, 256>}]} {
    %c0 = arith.constant 0 : index
    %c0_0 = arith.constant 0 : index
    %c0_1 = arith.constant 0 : index
    %0 = vector.load %arg1[%c0, %c0_0, %c0_1] : memref<1x4x256xf32, #tpu.memory_space<vmem>>, vector<1x4x256xf32>
    %cst = arith.constant dense<0.000000e+00> : vector<1x4xf32>
    %1 = vector.multi_reduction <add>, %0, %cst [2] : vector<1x4x256xf32> to vector<1x4xf32>
    %cst_2 = arith.constant 3.906250e-03 : f32
    %2 = vector.broadcast %cst_2 : f32 to vector<1x4xf32>
    %3 = arith.mulf %1, %2 : vector<1x4xf32>
    %c0_3 = arith.constant 0 : index
    %c0_4 = arith.constant 0 : index
    %4 = vector.load %arg2[%c0_3, %c0_4] : memref<4x2xf32, #tpu.memory_space<vmem>>, vector<4x2xf32>
    %cst_5 = arith.constant dense<0.000000e+00> : vector<1x2xf32>
    %5 = tpu.matmul %3, %4, %cst_5 {dimension_numbers = #tpu.dot_dimension_numbers<[1], [0], [0], [1], [0, 0, 1, 1], [], []>} : vector<1x4xf32>, vector<4x2xf32>, vector<1x2xf32> -> vector<1x2xf32>
    %c0_6 = arith.constant 0 : index
    %c0_7 = arith.constant 0 : index
    %6 = vector.load %arg3[%c0_6, %c0_7] : memref<1x2xf32, #tpu.memory_space<vmem>>, vector<1x2xf32>
    %7 = arith.addf %5, %6 : vector<1x2xf32>
    %cst_8 = arith.constant 0.000000e+00 : f32
    %8 = vector.broadcast %cst_8 : f32 to vector<1x2xf32>
    %9 = arith.maximumf %7, %8 : vector<1x2xf32>
    %c0_9 = arith.constant 0 : index
    %c0_10 = arith.constant 0 : index
    %10 = vector.load %arg4[%c0_9, %c0_10] : memref<2x4xf32, #tpu.memory_space<vmem>>, vector<2x4xf32>
    %cst_11 = arith.constant dense<0.000000e+00> : vector<1x4xf32>
    %11 = tpu.matmul %9, %10, %cst_11 {dimension_numbers = #tpu.dot_dimension_numbers<[1], [0], [0], [1], [0, 0, 1, 1], [], []>} : vector<1x2xf32>, vector<2x4xf32>, vector<1x4xf32> -> vector<1x4xf32>
    %c0_12 = arith.constant 0 : index
    %c0_13 = arith.constant 0 : index
    %12 = vector.load %arg5[%c0_12, %c0_13] : memref<1x4xf32, #tpu.memory_space<vmem>>, vector<1x4xf32>
    %13 = arith.addf %11, %12 : vector<1x4xf32>
    %14 = arith.negf %13 : vector<1x4xf32>
    %15 = math.exp %14 : vector<1x4xf32>
    %cst_14 = arith.constant 1.000000e+00 : f32
    %16 = vector.broadcast %cst_14 : f32 to vector<1x4xf32>
    %17 = arith.addf %16, %15 : vector<1x4xf32>
    %18 = arith.divf %16, %17 : vector<1x4xf32>
    %19 = vector.shape_cast %18 : vector<1x4xf32> to vector<1x4x1xf32>
    %20 = vector.broadcast %19 : vector<1x4x1xf32> to vector<1x4x256xf32>
    %21 = arith.mulf %0, %20 : vector<1x4x256xf32>
    %c0_15 = arith.constant 0 : index
    %c0_16 = arith.constant 0 : index
    %c0_17 = arith.constant 0 : index
    %22 = vector.load %arg6[%c0_15, %c0_16, %c0_17] : memref<1x4x256xf32, #tpu.memory_space<vmem>>, vector<1x4x256xf32>
    tpu.vector_store %arg6[%c0_15, %c0_16, %c0_17], %21 {strides = array<i32>} : memref<1x4x256xf32, #tpu.memory_space<vmem>>, vector<1x4x256xf32>,
    return
  }
  func.func @transform_0(%arg0: i32) -> (i32, i32, i32) {
    %c0_i32 = arith.constant 0 : i32
    %c0_i32_0 = arith.constant 0 : i32
    %c0_i32_1 = arith.constant 0 : i32
    return %arg0, %c0_i32, %c0_i32_0 : i32, i32, i32
  }
  func.func @transform_1(%arg0: i32) -> (i32, i32) {
    %c0_i32 = arith.constant 0 : i32
    %c0_i32_0 = arith.constant 0 : i32
    %c0_i32_1 = arith.constant 0 : i32
    return %c0_i32, %c0_i32_0 : i32, i32
  }
  func.func @transform_2(%arg0: i32) -> (i32, i32) {
    %c0_i32 = arith.constant 0 : i32
    %c0_i32_0 = arith.constant 0 : i32
    %c0_i32_1 = arith.constant 0 : i32
    return %c0_i32, %c0_i32_0 : i32, i32
  }
  func.func @transform_3(%arg0: i32) -> (i32, i32) {
    %c0_i32 = arith.constant 0 : i32
    %c0_i32_0 = arith.constant 0 : i32
    %c0_i32_1 = arith.constant 0 : i32
    return %c0_i32, %c0_i32_0 : i32, i32
  }
  func.func @transform_4(%arg0: i32) -> (i32, i32) {
    %c0_i32 = arith.constant 0 : i32
    %c0_i32_0 = arith.constant 0 : i32
    %c0_i32_1 = arith.constant 0 : i32
    return %c0_i32, %c0_i32_0 : i32, i32
  }
  func.func @transform_5(%arg0: i32) -> (i32, i32, i32) {
    %c0_i32 = arith.constant 0 : i32
    %c0_i32_0 = arith.constant 0 : i32
    %c0_i32_1 = arith.constant 0 : i32
    return %arg0, %c0_i32, %c0_i32_0 : i32, i32, i32
  }
}

</mosaic_0001>

<bundles_post_ra>
// kernel: tpu_custom_call.1
= control target key start
LH: loop header
LB: loop body
LE: loop exit
PB: predicated region body
PF: predicated region fallthrough
CT: control target
= control target key end

     0   :  { %10 = vsyncpa [#allocation3], 0  ;;  %s902_s0 = inlined_call_operand.hbm [shape: f32[2,4,256], index: 0, kind: input, shape index: {}]   ;;  %s903_s1 = inlined_call_operand.vmem [shape: f32[4,2], index: 1, kind: input, shape index: {}]   ;;  %s904_s2 = inlined_call_operand.vmem [shape: f32[1,2], index: 2, kind: input, shape index: {}]   ;;  %s905_s3 = inlined_call_operand.vmem [shape: f32[2,4], index: 3, kind: input, shape index: {}]   ;;  %s906_s4 = inlined_call_operand.vmem [shape: f32[1,4], index: 4, kind: input, shape index: {}]   ;;  %s907_s5 = inlined_call_operand.hbm [shape: f32[2,4,256], index: 5, kind: output, shape index: {}]  }
   0x1   :  { %12 = vsyncpa [#allocation3 + $0x1], 0 }
   0x2   :  { %13 = vsyncpa [#allocation4], 0 }
   0x3   :  { %15 = vsyncpa [#allocation4 + $0x1], 0  ;;  %s745_s18 = smov 0   ;;  %s747_s19 = smov 0  }
   0x4   :  { %s749_s20 = smov 0   ;;  %s751_s21 = smov 0  }
   0x5 LB: > { %s766_s22 = sadd.s32 4294967295, %s708_s21   ;;  %s527_s23 = sadd.s32 4294967294, %s708_s21   ;;  %s708_s21 = sphi %s751_s21, %s924_s21   ;;  %s704_s20 = sphi %s749_s20, %s923_s20   ;;  %s700_s19 = sphi %s747_s19, %s922_s19   ;;  %s696_s18 = sphi %s745_s18, %s921_s18  }
   0x6   : > { %s770_s24 = sadd.s32 1, %s708_s21   ;;  %s28_s25 = sadd.s32 1, %s704_s20 }
   0x7   : > { %s25_s26 = ssub.s32 %s708_s21, %s770_s24  ;;  %p35_p0 = scmp.ne.s32.totalorder %s704_s20, %s700_s19 }
   0x8   : > { %p26_p1 = scmp.eq.s32.totalorder %s25_s26, 0  ;;  %p36_p2 = scmp.eq.s32.totalorder %s708_s21, 0 }
   0x9   : > { %p41_p3 = scmp.ne.s32.totalorder %s700_s19, %s696_s18  ;;  %p42_p4 = scmp.eq.s32.totalorder %s766_s22, 0 }
   0xa   : > { %s782_s27 = scalar_select %p26_p1, %s704_s20, %s28_s25  }
   0xb   : > { %p784_p5 = por %p36_p2, %p35_p0  ;;  %p788_p6 = por %p42_p4, %p41_p3 }
   0xc   : > { %p149_p7 = scmp.eq.s32.totalorder %s766_s22, 1  ;;  %p155_p8 = scmp.eq.s32.totalorder %s527_s23, 1 }
   0xd   : > { %s911_s29 = scalar_select %p788_p6, 1, 0 }
   0xe   : > { %p574_p10 = scmp.lt.s32.totalorder %s708_s21, 2  ;;  %p795_p11 = por %p149_p7, %p35_p0 }
   0xf   : > { %p799_p12 = por %p155_p8, %p41_p3  ;;  %s187_s7 = sand.u32 1, %s704_s20  }
  0x10   : > { %s912_s30 = scalar_select %p795_p11, 1, 0 }
  0x11   : > { %s913_s6 = scalar_select %p799_p12, 1, 0 }
  0x12   : > { %s546_s8 = sshll.u32 %s708_s21, 7  ;;  %s530_s9 = sshll.u32 %s187_s7, 3 }
  0x13   : > { %s808_s12 = scalar_lea.hbm %s902_s0, %s546_s8  ;;  %s191_s13 = scalar_lea.vmem [#allocation2], %s530_s9 }
  0x14   : > { %s199_s14 = sshll.u32 %s191_s13, 4  ;;  %p812_p13 = pnand %p574_p10, %p784_p5  ;;  %s816_s14 = int_to_ptr.vmem [resolvable:$true] %s199_s14 }
  0x15   : > { %s188_s16 = scalar_lea.sflag [#allocation3], %s187_s7  ;;  %s616_s17 = scalar_lea.hbm %s808_s12, 128 }
  0x16   : > { %p617_p2 = scmp.ne.s32.totalorder %s808_s12, %s616_s17  ;;  %p618_p3 = pneg %p812_p13 }
  0x17   : > { %s621_s26 = scalar_lea.hbm %s902_s0, 256  ;;  %p622_p5 = scmp.lt.s32.totalorder %s808_s12, %s902_s0 }
  0x18   : > { %p619_p4 = pnand %p618_p3, %p617_p2  ;;  %p623_p8 = scmp.lt.s32.totalorder %s621_s26, %s616_s17 }
  0x1a   : > { %p620_p7 = pneg %p619_p4  ;;  %p624_p10 = por %p623_p8, %p622_p5 }
  0x1c   : > { %p625_p9 = pnand %p624_p10, %p620_p7 }
  0x1e   : > { %628 = shalt.err (!%p625_p9)
}
  0x1f   : > { %s629_s7 = scalar_lea.vmem %s816_s14, 128  ;;  %s710_s9 = smov [#allocation2]  }
  0x20   : > { %p630_p0 = scmp.ne.s32.totalorder %s816_s14, %s629_s7  ;;  %s634_s10 = sshll.u32 %s710_s9, 4  ;;  %s635_s10 = int_to_ptr.vmem [resolvable:$false] %s634_s10 }
  0x21   : > { %s636_s11 = scalar_lea.vmem %s635_s10, 256  ;;  %p637_p4 = scmp.lt.s32.totalorder %s816_s14, %s635_s10 }
  0x22   : > { %p632_p1 = pnand %p630_p0, %p618_p3  ;;  %p638_p12 = scmp.lt.s32.totalorder %s636_s11, %s629_s7 }
  0x24   : > { %p633_p2 = pneg %p632_p1  ;;  %p639_p11 = por %p638_p12, %p637_p4 }
  0x26   : > { %p640_p6 = pnand %p639_p11, %p633_p2 }
  0x28   : > { %643 = shalt.err (!%p640_p6)
}
  0x29   : > { %569 = dma.hbm_to_vmem [thread:$0]  (!%p812_p13), %s808_s12, 128, %s816_s14, %s188_s16  }
  0x2a   : > { %p915_p9 = scmp.lt.s32.totalorder %s708_s21, 3  ;;  %p916_p7 = scmp.ge.s32.totalorder %s708_s21, 1 }
  0x2c   : > { %p205_p0 = pnand %p916_p7, %p915_p9 }
  0x2d   : > { %s843_s13 = sand.u32 (!%p205_p0), 1, %s700_s19   ;;  %p917_p6 = scmp.ne.s32.totalorder (!%p205_p0), %s911_s29, 0 }
  0x2e   : > { %208 = sbr.rel (%p205_p0) target bundleno = 758 (0x2f6), region = 40  ;;  %s534_s17 = sshll.u32 (!%p205_p0), %s843_s13, 3 }
  0x2f   : > { %s211_s23 = scalar_lea.sflag (!%p205_p0), [#allocation3], %s843_s13  ;;  %s214_s15 = scalar_lea.vmem (!%p205_p0), [#allocation2], %s534_s17 }
  0x33   : > { %687 = dma.done.wait (%p917_p6), %s211_s23, 128  }
  0x34   : > { %689 = vsyncadd (%p917_p6), %s211_s23, 4294967168  ;;  %vm245_vm0 = vcmask 1043456   ;;  %v241_v0 = vld [vmem:[%s214_s15] sm:$0xff]  ;;  %v711_v5 = vmov 0.0   ;;  %vm712_vm1 = vmmov 0   ;;  %v255_v7 = vlaneseq  ;;  %s547_s7 = sshll.u32 %s766_s22, 7 }
  0x35   : > { %v243_v1 = vcombine.high %v241_v0, %v241_v0  ;;  %v246_v2 = vsel %vm245_vm0, %v241_v0, 0.0  ;;  %552 = vmatprep.subr.mxu0 %v711_v5  ;;  %v252_v6 = vld [vmem:[%s903_s1] sm:$0xf]  ;;  %557 = vmatprep.subr.mxu1 %v711_v5  ;;  %vm261_vm2 = vcmask 31744   ;;  %vm344_vm3 = vcmask 1041408   ;;  %s240_s9 = scalar_lea.vmem [#allocation5], %s534_s17  ;;  %s455_s15 = scalar_lea.hbm %s907_s5, %s547_s7 }
  0x36   : > { %553 = vmatpush3.msk.msra.mxu0 %vm245_vm0, %v252_v6  ;;  %554 = vmatprep.mubr.msk.f32.mxu0 %vm712_vm1, %v711_v5  ;;  %v256_v8 = vand.u32 127, %v255_v7  ;;  %v258_v9 = vshrl.u32 %v255_v7, 7  ;;  %v338_v14 = vld [vmem:[%s905_s3] sm:$0x3]  ;;  %vm340_vm4 = vcmask 15360   ;;  %s457_s10 = sshll.u32 %s240_s9, 4  ;;  %s458_s10 = int_to_ptr.vmem [resolvable:$true] %s457_s10 }
  0x37   : > { %v247_v3 = vsel %vm245_vm0, %v243_v1, 0.0  ;;  %559 = vmatprep.mubr.msk.f32.mxu1 %vm712_vm1, %v711_v5  ;;  %558 = vmatpush3.msk.msra.mxu1 %vm344_vm3, %v338_v14  ;;  %v253_v15 = vld [vmem:[%s904_s2] sm:$0x1]  ;;  %v713_v30 = vmov 839922192   ;;  %s443_s12 = scalar_lea.sflag [#allocation4], %s843_s13 }
  0x38   : > { %v248_v4 = vadd.f32 %v247_v3, %v246_v2  ;;  %v259_v10 = vsub.s32 %v256_v8, %v258_v9  ;;  %v339_v20 = vld [vmem:[%s906_s4] sm:$0x1]  ;;  %v426_v27 = vsub.s32 0, %v258_v9  ;;  %v433_v31 = vunpack.c.l.s4 %v713_v30  ;;  %s644_s14 = scalar_lea.vmem %s458_s10, 128  ;;  %p918_p12 = scmp.ne.s32.totalorder %s912_s30, 0 }
  0x39   : > { %p645_p11 = scmp.ne.s32.totalorder %s458_s10, %s644_s14  ;;  %s714_s29 = smov [#allocation5]  }
  0x3a   : > { %249 = vadd.xlane.f32.xlu0 %v248_v4  ;;  %v434_v32 = vunpack.c.0.s8 %v433_v31  ;;  %s648_s16 = sshll.u32 %s714_s29, 4  ;;  %s649_s16 = int_to_ptr.vmem [resolvable:$false] %s648_s16 }
  0x3b   : > { %p646_p13 = pnand %p645_p11, %p918_p12  ;;  %s650_s22 = scalar_lea.vmem %s649_s16, 256 }
  0x3c   : > { %v437_v33 = vsub.s32 %v434_v32, %v258_v9  ;;  %p651_p3 = scmp.lt.s32.totalorder %s458_s10, %s649_s16  ;;  %p652_p5 = scmp.lt.s32.totalorder %s650_s22, %s644_s14 }
  0x3d   : > { %p647_p1 = pneg %p646_p13 }
  0x3e   : > { %p653_p8 = por %p652_p5, %p651_p3 }
  0x40   : > { %p654_p10 = pnand %p653_p8, %p647_p1 }
  0xc3   : > { %v250_v11 = vpop.xlane.xlu0 %249 }
  0xc4   : > { %v251_v12 = vmul.f32 0.00390625, %v250_v11 }
  0xc6   : > { %v260_v13 = vrot.slane %v251_v12, %v259_v10 }
  0xc8   : > { %555 = vmatmul.mubr.msk.f32.vlgmr.msra.gmra.mxu0 %vm261_vm2, %v260_v13 }
 0x188   : > { %v333_v16 = vpop.f32.mrf.mxu0 }
 0x189   : > { %v334_v17 = vadd.f32 %v333_v16, %v253_v15 }
 0x18a   : > { %v556_v18 = vpop.f32.mrf.mxu0 }
 0x18b   : > { %v337_v19 = vmax.f32 %v334_v17, 0.0 }
 0x18d   : > { %560 = vmatmul.mubr.msk.f32.vlgmr.msra.gmra.mxu1 %vm340_vm4, %v337_v19 }
 0x24d   : > { %v414_v21 = vpop.f32.mrf.mxu1 }
 0x24e   : > { %v415_v22 = vadd.f32 %v414_v21, %v339_v20 }
 0x24f   : > { %v561_v23 = vpop.f32.mrf.mxu1 }
 0x250   : > { %v540_v24 = vmul.f32 -1.442695, %v415_v22 }
 0x252   : > { %612 = vpow2.f32 %v540_v24 }
 0x25f   : > { %v613_v25 = vpop.eup %612 }
 0x260   : > { %v421_v26 = vadd.f32 1.0, %v613_v25 }
 0x262   : > { %614 = vrcp.f32 %v421_v26 }
 0x26f   : > { %v615_v28 = vpop.eup %614 }
 0x270   : > { %v427_v29 = vrot.slane %v615_v28, %v426_v27 }
 0x272   : > { %429 = vbcast.lane.b32.xlu0 %v427_v29, 256 }
 0x2e4   : > { %v430_v34 = vpop.permute.xlu0 %429 }
 0x2e5   : > { %v438_v35 = vrot.slane %v430_v34, %v437_v33 }
 0x2e7   : > { %v440_v36 = vmul.f32 %v438_v35, %v241_v0 }
 0x2e9   : > { %441 = vst [vmem:[%s240_s9] sm:$0xff] %v440_v36 }
 0x2ea   : > { %657 = shalt.err (!%p654_p10)
}
 0x2eb   : > { %s658_s17 = scalar_lea.hbm %s455_s15, 128  ;;  %s662_s26 = scalar_lea.hbm %s907_s5, 256 }
 0x2ec   : > { %p659_p2 = scmp.ne.s32.totalorder %s455_s15, %s658_s17  ;;  %p663_p7 = scmp.lt.s32.totalorder %s455_s15, %s907_s5 }
 0x2ed   : > { %p664_p0 = scmp.lt.s32.totalorder %s662_s26, %s658_s17 }
 0x2ee   : > { %p660_p4 = pnand %p659_p2, %p918_p12 }
 0x2ef   : > { %p665_p6 = por %p664_p0, %p663_p7 }
 0x2f0   : > { %p661_p9 = pneg %p660_p4 }
 0x2f2   : > { %p666_p11 = pnand %p665_p6, %p661_p9 }
 0x2f4   : > { %669 = shalt.err (!%p666_p11)
}
 0x2f5   : > { %564 = dma.vmem_to_hbm [thread:$0]  (%p918_p12), %s458_s10, 128, %s455_s15, %s443_s12  }
 0x2f6 PF: > { %s469_s7 = sand.u32 1, %s696_s18   ;;  %p919_p13 = scmp.ne.s32.totalorder %s913_s6, 0 }
 0x2f7   : > { %p920_p1 = scmp.ge.s32.totalorder %s708_s21, 2  ;;  %s470_s9 = scalar_lea.sflag [#allocation4], %s469_s7 }
 0x2f9   : > { %p571_p3 = pnand %p920_p1, %p919_p13 }
 0x2fb   : > { %p572_p5 = pneg %p571_p3 }
 0x2fd   : > { %691 = dma.done.wait (%p572_p5), %s470_s9, 128  }
 0x2fe   : > { %693 = vsyncadd (%p572_p5), %s470_s9, 4294967168  ;;  %p18_p8 = scmp.ge.s32.totalorder %s770_s24, 4   ;;  %s921_s18 = smov %s700_s19 }
 0x2ff   : > { %s922_s19 = smov %s704_s20  ;;  %s923_s20 = smov %s782_s27 }
 0x300   : > { %s924_s21 = smov %s770_s24  ;;  %20 = sbr.rel (!%p18_p8) target bundleno = 5 (0x5), region = 85 }
 0x305   :  { %475 = vsyncpa [#allocation3], 1 }
 0x306   :  { %477 = vsyncpa [#allocation3 + $0x1], 1 }
 0x307   :  { %478 = vsyncpa [#allocation4], 1 }
 0x308   :  { %480 = vsyncpa [#allocation4 + $0x1], 1 }

</bundles_post_ra>
